<compile_context>
chip_gen: v7x
topology: tpu7x:2x2x1
jax: 0.10.0
libtpu: 0.0.40
codegen_flags: <defaults>
</compile_context>

<pallas_src>
import jax
import jax.numpy as jnp
from jax.experimental import pallas as pl
from jax.experimental.pallas import tpu as pltpu

_LANE_CANDIDATES = (2048, 1024, 512, 256, 128)  # lane-dense widths (multiples of 128)


def _device_kind() -> str:
    try:
        return jax.devices()[0].device_kind.lower()
    except Exception:
        return ""


def _generation_params():
    """(target_block_bytes, vmem_limit_bytes, dimension_semantics) per chip."""
    kind = _device_kind()
    if "v7" in kind:
        # 3.2 TB/s HBM/TC -> big blocks to amortize the ~0.35us grid-step
        # overhead; 2x(in+out) x 8 MiB = 32 MiB, well under 64 MiB physical.
        return 8 << 20, 48 << 20, (pltpu.CORE_PARALLEL,)
    if "v6" in kind:
        # 4 MiB blocks -> 16 MiB double-buffered, fits 32 MiB scoped VMEM.
        return 4 << 20, 32 << 20, (pltpu.PARALLEL,)
    # v5e / unknown: 2 MiB blocks (8 MiB total) fits the 16 MiB default; raise
    # the limit slightly for headroom.
    return 2 << 20, 24 << 20, (pltpu.PARALLEL,)


def _backbone_identity_kernel(x_ref, o_ref):
    # Full-tile pass-through; subclasses replace this body with real compute.
    # Binding resource is HBM DMA, so the in-body vld/vst copy is free.
    o_ref[...] = x_ref[...]


def _backbone_template_forward(x: jnp.ndarray) -> jnp.ndarray:
    """Tiled Pallas pass-through: the pipeline template for concrete subclasses."""
    orig_shape = x.shape
    total = x.size
    itemsize = jnp.dtype(x.dtype).itemsize

    # Lane-dense layout with NO padding: largest multiple of 128 dividing total.
    lane = next((c for c in _LANE_CANDIDATES if total % c == 0), None)
    if lane is None:
        # TODO(synk): for large totals not divisible by 128, tile over the
        # original trailing dims instead of a single full-extent block.
        rows, lane = 1, total
    else:
        rows = total // lane
    x2d = x.reshape(rows, lane)  # pure bitcast, no host-side copy

    target_block_bytes, vmem_limit, dim_sem = _generation_params()

    # dtype-aware row block: multiple of the sublane packing (8 f32 / 16 bf16 /
    # 32 int8); partial edge blocks are handled by Pallas masked writes.
    sublane_mult = max(8, 32 // itemsize)
    block_rows = target_block_bytes // (lane * itemsize)
    block_rows = max((block_rows // sublane_mult) * sublane_mult, sublane_mult)
    if rows <= block_rows:
        block_rows = rows  # full extent is exempt from the (8,128) rule

    grid = (pl.cdiv(rows, block_rows),)

    out = pl.pallas_call(
        _backbone_identity_kernel,
        out_shape=jax.ShapeDtypeStruct((rows, lane), x2d.dtype),
        grid=grid,
        in_specs=[pl.BlockSpec((block_rows, lane), lambda i: (i, 0))],
        out_specs=pl.BlockSpec((block_rows, lane), lambda i: (i, 0)),
        compiler_params=pltpu.CompilerParams(
            dimension_semantics=dim_sem,
            vmem_limit_bytes=vmem_limit,
        ),
        # Purely memory-bound: one full read + one full write.
        cost_estimate=pl.CostEstimate(
            flops=0, transcendentals=0, bytes_accessed=2 * total * itemsize),
    )(x2d)

    return out.reshape(orig_shape)


def backbone_base_forward(x: jnp.ndarray, *, run_pallas_template: bool = False) -> jnp.ndarray:
    """Pallas implementation of _BackboneBase's (pass-through) forward.

    The base class applies no learned transform, so by default we short-circuit
    and return `x` untouched (zero HBM traffic).  `run_pallas_template=True`
    exercises the tiled identity kernel that concrete subclasses specialize.
    """
    if not run_pallas_template:
        return jnp.asarray(x)
    return _backbone_template_forward(x)


# _BackboneBase defines no trainable parameters; expose that explicitly.
# TODO(synk): save_weights / load_weights / freeze_weights are host-side
#             state-dict I/O with no Pallas equivalent.
def num_parameters() -> int:
    return 0


if __name__ == "__main__":
    key = jax.random.PRNGKey(0)
    # Small NCHW input consistent with a backbone: batch=2, channels=4, 16x16.
    x = jax.random.normal(key, (2, 4, 16, 16), dtype=jnp.float32)

    # Base-class path: identity short-circuit (no pallas_call launched).
    y_fast = jax.block_until_ready(backbone_base_forward(x))

    # Template path: run the tiled Pallas pipeline once.
    y_kernel = jax.block_until_ready(
        backbone_base_forward(x, run_pallas_template=True))

    assert y_fast.shape == x.shape and y_fast.dtype == x.dtype
    assert y_kernel.shape == x.shape and y_kernel.dtype == x.dtype
    assert bool(jnp.allclose(y_fast, x))
    assert bool(jnp.allclose(y_kernel, x))
    assert num_parameters() == 0

    print("KERNEL_OK")
</pallas_src>

<mosaic_0001>
module attributes {stable_mosaic.version = 11 : i64} {
  func.func @_backbone_identity_kernel(%arg0: i32, %arg1: memref<1x2048xf32, #tpu.memory_space<vmem>>, %arg2: memref<1x2048xf32, #tpu.memory_space<vmem>>) attributes {dimension_semantics = [#tpu.dimension_semantics<parallel>], iteration_bounds = array<i64: 1>, scalar_prefetch = 0 : i64, scratch_operands = 0 : i64, tpu.core_type = #tpu.core_type<tc>, window_params = [{transform_indices = @transform_0, window_bounds = array<i64: 1, 2048>}, {transform_indices = @transform_1, window_bounds = array<i64: 1, 2048>}]} {
    %c0 = arith.constant 0 : index
    %c0_0 = arith.constant 0 : index
    %0 = vector.load %arg1[%c0, %c0_0] : memref<1x2048xf32, #tpu.memory_space<vmem>>, vector<1x2048xf32>
    %c0_1 = arith.constant 0 : index
    %c0_2 = arith.constant 0 : index
    %1 = vector.load %arg2[%c0_1, %c0_2] : memref<1x2048xf32, #tpu.memory_space<vmem>>, vector<1x2048xf32>
    tpu.vector_store %arg2[%c0_1, %c0_2], %0 {strides = array<i32>} : memref<1x2048xf32, #tpu.memory_space<vmem>>, vector<1x2048xf32>,
    return
  }
  func.func @transform_0(%arg0: i32) -> (i32, i32) {
    %c0_i32 = arith.constant 0 : i32
    %c0_i32_0 = arith.constant 0 : i32
    return %arg0, %c0_i32 : i32, i32
  }
  func.func @transform_1(%arg0: i32) -> (i32, i32) {
    %c0_i32 = arith.constant 0 : i32
    %c0_i32_0 = arith.constant 0 : i32
    return %arg0, %c0_i32 : i32, i32
  }
}

</mosaic_0001>

<bundles_post_ra>
// kernel: tpu_custom_call.1
= control target key start
LH: loop header
LB: loop body
LE: loop exit
PB: predicated region body
PF: predicated region fallthrough
CT: control target
= control target key end

     0   :  { %6 = vsyncpa [#allocation3], 0  ;;  %s126_s0 = inlined_call_operand.hbm [shape: f32[1,2048], index: 0, kind: input, shape index: {}]   ;;  %s127_s1 = inlined_call_operand.hbm [shape: f32[1,2048], index: 1, kind: output, shape index: {}]  }
   0x1   :  { %7 = vsyncpa [#allocation4], 0  ;;  %s90_s6 = smov [#allocation2]   ;;  %s42_s10 = scalar_lea.hbm %s126_s0, 256 }
   0x2   :  { %s14_s7 = sshll.u32 %s90_s6, 4  ;;  %p43_p0 = scmp.ne.s32.totalorder %s126_s0, %s42_s10  ;;  %s15_s7 = int_to_ptr.vmem [resolvable:$true] %s14_s7 }
   0x3   :  { %p46_p1 = scmp.lt.u32.totalorder %s42_s10, %s126_s0 }
   0x5   :  { %p48_p2 = pnand %p46_p1, %p43_p0 }
   0x7   :  { %51 = shalt.err (!%p48_p2)
}
   0x8   :  { %s52_s15 = scalar_lea.vmem %s15_s7, 256  ;;  %p57_p4 = scmp.lt.s32.totalorder %s15_s7, %s15_s7 }
   0x9   :  { %p53_p3 = scmp.ne.s32.totalorder %s15_s7, %s52_s15  ;;  %p58_p5 = scmp.lt.s32.totalorder %s52_s15, %s52_s15 }
   0xb   :  { %p59_p6 = por %p58_p5, %p57_p4 }
   0xd   :  { %p60_p7 = pnand %p59_p6, %p53_p3 }
   0xf   :  { %63 = shalt.err (!%p60_p7)
}
  0x10   :  { %17 = dma.hbm_to_vmem [thread:$0]  %s126_s0, 256, %s15_s7, [#allocation3]  }
  0x11   :  { %86 = dma.done.wait [#allocation3], 256  }
  0x12   :  { %87 = vsyncadd [#allocation3], 4294967040  ;;  %s91_s18 = smov [#allocation5]   ;;  %v21_v0 = vld [vmem:[#allocation2] sm:$0xff]  ;;  %v22_v1 = vld [vmem:[#allocation2 + $0x8] sm:$0xff] }
  0x13   :  { %s31_s19 = sshll.u32 %s91_s18, 4  ;;  %23 = vst [vmem:[#allocation5] sm:$0xff] %v21_v0  ;;  %24 = vst [vmem:[#allocation5 + $0x8] sm:$0xff] %v22_v1  ;;  %s32_s19 = int_to_ptr.vmem [resolvable:$true] %s31_s19 }
  0x14   :  { %s64_s20 = scalar_lea.vmem %s32_s19, 256  ;;  %p69_p9 = scmp.lt.s32.totalorder %s32_s19, %s32_s19 }
  0x15   :  { %p65_p8 = scmp.ne.s32.totalorder %s32_s19, %s64_s20  ;;  %p70_p10 = scmp.lt.s32.totalorder %s64_s20, %s64_s20 }
  0x17   :  { %p71_p11 = por %p70_p10, %p69_p9 }
  0x19   :  { %p72_p12 = pnand %p71_p11, %p65_p8 }
  0x1b   :  { %75 = shalt.err (!%p72_p12)
}
  0x1c   :  { %s76_s0 = scalar_lea.hbm %s127_s1, 256 }
  0x1d   :  { %p77_p13 = scmp.ne.s32.totalorder %s127_s1, %s76_s0  ;;  %p80_p0 = scmp.lt.u32.totalorder %s76_s0, %s127_s1 }
  0x1f   :  { %p82_p1 = pnand %p80_p0, %p77_p13 }
  0x21   :  { %85 = shalt.err (!%p82_p1)
}
  0x22   :  { %34 = dma.vmem_to_hbm [thread:$0]  %s32_s19, 256, %s127_s1, [#allocation4]  }
  0x23   :  { %88 = dma.done.wait [#allocation4], 256  }
  0x24   :  { %89 = vsyncadd [#allocation4], 4294967040 }
  0x25   :  { %38 = vsyncpa [#allocation3], 1 }
  0x26   :  { %39 = vsyncpa [#allocation4], 1 }

</bundles_post_ra>
